<compile_context>
chip_gen: v7x
topology: tpu7x:2x2x1
jax: 0.10.0
libtpu: 0.0.40
codegen_flags: <defaults>
</compile_context>

<pallas_src>
import jax
import jax.numpy as jnp
from jax.experimental import pallas as pl
from jax.experimental.pallas import tpu as pltpu


def _ffn_kernel(x_ref, w1_ref, b1_ref, w2_ref, b2_ref, o_ref, acc_ref):
    k = pl.program_id(1)

    @pl.when(k == 0)
    def _init():
        acc_ref[...] = jnp.zeros_like(acc_ref)

    # linear_1 (bf16 operands, f32 accumulation on the MXU) + bias + ReLU.
    h = jnp.dot(x_ref[...], w1_ref[...], preferred_element_type=jnp.float32)
    h = jnp.maximum(h + b1_ref[...], 0.0)                       # (TM, TF) f32

    # TODO(synk): training-mode dropout (stochastic masking) is omitted;
    # nn.Dropout is the identity in eval/inference mode.

    # Partial linear_2 contribution for this d_ff chunk, accumulated in f32.
    acc_ref[...] += jnp.dot(h.astype(jnp.bfloat16), w2_ref[...],
                            preferred_element_type=jnp.float32)

    @pl.when(k == pl.num_programs(1) - 1)
    def _finalize():
        # b2 add only on the finalize step (no per-iteration broadcast).
        o_ref[...] = (acc_ref[...] + b2_ref[...]).astype(o_ref.dtype)


def _round_up(n, m):
    return ((n + m - 1) // m) * m


def positionwise_ffn(x, w1, b1, w2, b2, *, block_tokens=512, block_ff=512):
    """x: (..., d_model).  w1: (d_model, d_ff), b1: (1, d_ff),
    w2: (d_ff, d_model), b2: (1, d_model).  Returns same shape/dtype as x."""
    orig_shape = x.shape
    out_dtype = x.dtype
    d_model = orig_shape[-1]
    d_ff = w1.shape[1]

    # bf16 matmul operands (MXU peak); biases / accumulation stay f32.
    x2 = x.reshape(-1, d_model).astype(jnp.bfloat16)
    w1 = w1.astype(jnp.bfloat16)
    w2 = w2.astype(jnp.bfloat16)
    b1 = b1.astype(jnp.float32)
    b2 = b2.astype(jnp.float32)
    n = x2.shape[0]

    # Token tile: multiple of 16 (bf16 sublane packing); ragged last token block
    # is handled by Pallas (rows independent, OOB writes dropped).
    tm = min(block_tokens, _round_up(n, 16))

    # d_ff tile: multiple of 128 when tiling; pad the weights (N-independent,
    # exact: relu(0)@0 == 0) if d_ff is not a multiple of the tile.
    tf = min(block_ff, d_ff)
    if tf < d_ff:
        tf = max(128, (tf // 128) * 128)
    d_ff_pad = _round_up(d_ff, tf)
    if d_ff_pad != d_ff:
        pad = d_ff_pad - d_ff
        w1 = jnp.pad(w1, ((0, 0), (0, pad)))
        b1 = jnp.pad(b1, ((0, 0), (0, pad)))
        w2 = jnp.pad(w2, ((0, pad), (0, 0)))

    grid = (pl.cdiv(n, tm), d_ff_pad // tf)

    itemsize = jnp.dtype(jnp.bfloat16).itemsize
    cost = pl.CostEstimate(
        flops=4 * n * d_model * d_ff_pad,
        transcendentals=0,
        bytes_accessed=(x2.size * itemsize + w1.size * itemsize
                        + w2.size * itemsize + b1.size * 4 + b2.size * 4
                        + n * d_model * jnp.dtype(out_dtype).itemsize),
    )

    out = pl.pallas_call(
        _ffn_kernel,
        out_shape=jax.ShapeDtypeStruct((n, d_model), out_dtype),
        grid_spec=pltpu.PrefetchScalarGridSpec(
            num_scalar_prefetch=0,
            grid=grid,
            in_specs=[
                # token tile: constant in k -> fetched once per token tile
                pl.BlockSpec((tm, d_model), lambda i, k: (i, 0)),
                # streamed d_ff-tiled weights / biases
                pl.BlockSpec((d_model, tf), lambda i, k: (0, k)),
                pl.BlockSpec((1, tf), lambda i, k: (0, k)),
                pl.BlockSpec((tf, d_model), lambda i, k: (k, 0)),
                # b2: constant block, used only on finalize
                pl.BlockSpec((1, d_model), lambda i, k: (0, 0)),
            ],
            out_specs=pl.BlockSpec((tm, d_model), lambda i, k: (i, 0)),
            scratch_shapes=[pltpu.VMEM((tm, d_model), jnp.float32)],
        ),
        compiler_params=pltpu.CompilerParams(
            dimension_semantics=("parallel", "arbitrary"),
        ),
        cost_estimate=cost,
    )(x2, w1, b1, w2, b2)

    return out.reshape(orig_shape)


def _init_params(key, d_model, d_ff):
    """Deterministic synthetic parameters matching nn.Linear init ranges."""
    ks = jax.random.split(key, 4)
    s1 = 1.0 / jnp.sqrt(d_model)
    s2 = 1.0 / jnp.sqrt(d_ff)
    w1 = jax.random.uniform(ks[0], (d_model, d_ff), jnp.float32, -s1, s1)
    b1 = jax.random.uniform(ks[1], (1, d_ff), jnp.float32, -s1, s1)
    w2 = jax.random.uniform(ks[2], (d_ff, d_model), jnp.float32, -s2, s2)
    b2 = jax.random.uniform(ks[3], (1, d_model), jnp.float32, -s2, s2)
    return w1, b1, w2, b2


def _reference_bf16(x, w1, b1, w2, b2):
    """Mirrors the kernel's bf16-operand / f32-accumulate math."""
    xb = x.astype(jnp.bfloat16).astype(jnp.float32)
    w1b = w1.astype(jnp.bfloat16).astype(jnp.float32)
    w2b = w2.astype(jnp.bfloat16).astype(jnp.float32)
    h = jax.nn.relu(xb @ w1b + b1)
    hb = h.astype(jnp.bfloat16).astype(jnp.float32)
    return hb @ w2b + b2


if __name__ == "__main__":
    B, S, d_model, d_ff = 2, 8, 128, 512

    key = jax.random.PRNGKey(0)
    kx, kp = jax.random.split(key)
    x = jax.random.normal(kx, (B, S, d_model), dtype=jnp.float32)
    params = _init_params(kp, d_model, d_ff)

    out = positionwise_ffn(x, *params)
    out = jax.block_until_ready(out)

    ref = _reference_bf16(x, *params)
    assert out.shape == (B, S, d_model)
    assert jnp.allclose(out, ref, atol=5e-3, rtol=5e-3)

    print("KERNEL_OK")
</pallas_src>

<mosaic_0001>
module attributes {stable_mosaic.version = 11 : i64} {
  func.func @_ffn_kernel(%arg0: i32, %arg1: i32, %arg2: memref<16x128xbf16, #tpu.memory_space<vmem>>, %arg3: memref<128x512xbf16, #tpu.memory_space<vmem>>, %arg4: memref<1x512xf32, #tpu.memory_space<vmem>>, %arg5: memref<512x128xbf16, #tpu.memory_space<vmem>>, %arg6: memref<1x128xf32, #tpu.memory_space<vmem>>, %arg7: memref<16x128xf32, #tpu.memory_space<vmem>>, %arg8: memref<16x128xf32, #tpu.memory_space<vmem>>) attributes {dimension_semantics = [#tpu.dimension_semantics<parallel>, #tpu.dimension_semantics<arbitrary>], iteration_bounds = array<i64: 1, 1>, scalar_prefetch = 0 : i64, scratch_operands = 1 : i64, tpu.core_type = #tpu.core_type<tc>, window_params = [{transform_indices = @transform_0, window_bounds = array<i64: 16, 128>}, {transform_indices = @transform_1, window_bounds = array<i64: 128, 512>}, {transform_indices = @transform_2, window_bounds = array<i64: 1, 512>}, {transform_indices = @transform_3, window_bounds = array<i64: 512, 128>}, {pipeline_mode = #tpu.pipeline_mode<synchronous>, transform_indices = @transform_4, window_bounds = array<i64: 1, 128>}, {transform_indices = @transform_5, window_bounds = array<i64: 16, 128>}]} {
    %c0_i32 = arith.constant 0 : i32
    %0 = arith.cmpi eq, %arg1, %c0_i32 : i32
    %1 = arith.extui %0 : i1 to i32
    %c0_i32_0 = arith.constant 0 : i32
    %2 = arith.cmpi ne, %1, %c0_i32_0 : i32
    scf.if %2 {
      %cst_16 = arith.constant 0.000000e+00 : f32
      %20 = vector.broadcast %cst_16 : f32 to vector<16x128xf32>
      %c0_17 = arith.constant 0 : index
      %c0_18 = arith.constant 0 : index
      %21 = vector.load %arg8[%c0_17, %c0_18] : memref<16x128xf32, #tpu.memory_space<vmem>>, vector<16x128xf32>
      tpu.vector_store %arg8[%c0_17, %c0_18], %20 {strides = array<i32>} : memref<16x128xf32, #tpu.memory_space<vmem>>, vector<16x128xf32>,
    } else {
    }
    %c0 = arith.constant 0 : index
    %c0_1 = arith.constant 0 : index
    %3 = vector.load %arg2[%c0, %c0_1] : memref<16x128xbf16, #tpu.memory_space<vmem>>, vector<16x128xbf16>
    %c0_2 = arith.constant 0 : index
    %c0_3 = arith.constant 0 : index
    %4 = vector.load %arg3[%c0_2, %c0_3] : memref<128x512xbf16, #tpu.memory_space<vmem>>, vector<128x512xbf16>
    %cst = arith.constant dense<0.000000e+00> : vector<16x512xf32>
    %5 = tpu.matmul %3, %4, %cst {dimension_numbers = #tpu.dot_dimension_numbers<[1], [0], [0], [1], [0, 0, 1, 1], [], []>} : vector<16x128xbf16>, vector<128x512xbf16>, vector<16x512xf32> -> vector<16x512xf32>
    %c0_4 = arith.constant 0 : index
    %c0_5 = arith.constant 0 : index
    %6 = vector.load %arg4[%c0_4, %c0_5] : memref<1x512xf32, #tpu.memory_space<vmem>>, vector<1x512xf32>
    %7 = vector.broadcast %6 : vector<1x512xf32> to vector<16x512xf32>
    %8 = arith.addf %5, %7 : vector<16x512xf32>
    %cst_6 = arith.constant 0.000000e+00 : f32
    %9 = vector.broadcast %cst_6 : f32 to vector<16x512xf32>
    %10 = arith.maximumf %8, %9 : vector<16x512xf32>
    %c0_7 = arith.constant 0 : index
    %c0_8 = arith.constant 0 : index
    %11 = vector.load %arg8[%c0_7, %c0_8] : memref<16x128xf32, #tpu.memory_space<vmem>>, vector<16x128xf32>
    %12 = arith.truncf %10 : vector<16x512xf32> to vector<16x512xbf16>
    %c0_9 = arith.constant 0 : index
    %c0_10 = arith.constant 0 : index
    %13 = vector.load %arg5[%c0_9, %c0_10] : memref<512x128xbf16, #tpu.memory_space<vmem>>, vector<512x128xbf16>
    %cst_11 = arith.constant dense<0.000000e+00> : vector<16x128xf32>
    %14 = tpu.matmul %12, %13, %cst_11 {dimension_numbers = #tpu.dot_dimension_numbers<[1], [0], [0], [1], [0, 0, 1, 1], [], []>} : vector<16x512xbf16>, vector<512x128xbf16>, vector<16x128xf32> -> vector<16x128xf32>
    %15 = arith.addf %11, %14 : vector<16x128xf32>
    %c0_12 = arith.constant 0 : index
    %c0_13 = arith.constant 0 : index
    %16 = vector.load %arg8[%c0_12, %c0_13] : memref<16x128xf32, #tpu.memory_space<vmem>>, vector<16x128xf32>
    tpu.vector_store %arg8[%c0_12, %c0_13], %15 {strides = array<i32>} : memref<16x128xf32, #tpu.memory_space<vmem>>, vector<16x128xf32>,
    %c0_i32_14 = arith.constant 0 : i32
    %17 = arith.cmpi eq, %arg1, %c0_i32_14 : i32
    %18 = arith.extui %17 : i1 to i32
    %c0_i32_15 = arith.constant 0 : i32
    %19 = arith.cmpi ne, %18, %c0_i32_15 : i32
    scf.if %19 {
      %c0_16 = arith.constant 0 : index
      %c0_17 = arith.constant 0 : index
      %20 = vector.load %arg8[%c0_16, %c0_17] : memref<16x128xf32, #tpu.memory_space<vmem>>, vector<16x128xf32>
      %c0_18 = arith.constant 0 : index
      %c0_19 = arith.constant 0 : index
      %21 = vector.load %arg6[%c0_18, %c0_19] : memref<1x128xf32, #tpu.memory_space<vmem>>, vector<1x128xf32>
      %22 = vector.broadcast %21 : vector<1x128xf32> to vector<16x128xf32>
      %23 = arith.addf %20, %22 : vector<16x128xf32>
      %c0_20 = arith.constant 0 : index
      %c0_21 = arith.constant 0 : index
      %24 = vector.load %arg7[%c0_20, %c0_21] : memref<16x128xf32, #tpu.memory_space<vmem>>, vector<16x128xf32>
      tpu.vector_store %arg7[%c0_20, %c0_21], %23 {strides = array<i32>} : memref<16x128xf32, #tpu.memory_space<vmem>>, vector<16x128xf32>,
    } else {
    }
    return
  }
  func.func @transform_0(%arg0: i32, %arg1: i32) -> (i32, i32) {
    %c0_i32 = arith.constant 0 : i32
    %c0_i32_0 = arith.constant 0 : i32
    return %arg0, %c0_i32 : i32, i32
  }
  func.func @transform_1(%arg0: i32, %arg1: i32) -> (i32, i32) {
    %c0_i32 = arith.constant 0 : i32
    %c0_i32_0 = arith.constant 0 : i32
    return %c0_i32, %arg1 : i32, i32
  }
  func.func @transform_2(%arg0: i32, %arg1: i32) -> (i32, i32) {
    %c0_i32 = arith.constant 0 : i32
    %c0_i32_0 = arith.constant 0 : i32
    return %c0_i32, %arg1 : i32, i32
  }
  func.func @transform_3(%arg0: i32, %arg1: i32) -> (i32, i32) {
    %c0_i32 = arith.constant 0 : i32
    %c0_i32_0 = arith.constant 0 : i32
    return %arg1, %c0_i32 : i32, i32
  }
  func.func @transform_4(%arg0: i32, %arg1: i32) -> (i32, i32) {
    %c0_i32 = arith.constant 0 : i32
    %c0_i32_0 = arith.constant 0 : i32
    %c0_i32_1 = arith.constant 0 : i32
    return %c0_i32, %c0_i32_0 : i32, i32
  }
  func.func @transform_5(%arg0: i32, %arg1: i32) -> (i32, i32) {
    %c0_i32 = arith.constant 0 : i32
    %c0_i32_0 = arith.constant 0 : i32
    return %arg0, %c0_i32 : i32, i32
  }
}

</mosaic_0001>

<bundles_post_ra>
// kernel: tpu_custom_call.1
= control target key start
LH: loop header
LB: loop body
LE: loop exit
PB: predicated region body
PF: predicated region fallthrough
CT: control target
= control target key end

     0   :  { %10 = vsyncpa [#allocation4], 0  ;;  %s1158_s0 = inlined_call_operand.hbm [shape: bf16[16,128], index: 0, kind: input, shape index: {}]   ;;  %s1159_s1 = inlined_call_operand.hbm [shape: bf16[128,512], index: 1, kind: input, shape index: {}]   ;;  %s1160_s2 = inlined_call_operand.vmem [shape: f32[1,512], index: 2, kind: input, shape index: {}]   ;;  %s1161_s3 = inlined_call_operand.hbm [shape: bf16[512,128], index: 3, kind: input, shape index: {}]   ;;  %s1162_s4 = inlined_call_operand.vmem [shape: f32[1,128], index: 4, kind: input, shape index: {}]   ;;  %s1163_s5 = inlined_call_operand.hbm [shape: f32[16,128], index: 5, kind: output, shape index: {}]  }
   0x1   :  { %11 = vsyncpa [#allocation7], 0 }
   0x2   :  { %12 = vsyncpa [#allocation5], 0  ;;  %s1063_s18 = smov [#allocation6]   ;;  %s969_s22 = scalar_lea.hbm %s1159_s1, 4096 }
   0x3   :  { %s30_s19 = sshll.u32 %s1063_s18, 4  ;;  %p970_p0 = scmp.ne.s32.totalorder %s1159_s1, %s969_s22  ;;  %s31_s19 = int_to_ptr.vmem [resolvable:$true] %s30_s19 }
   0x4   :  { %p973_p1 = scmp.lt.u32.totalorder %s969_s22, %s1159_s1 }
   0x6   :  { %p975_p2 = pnand %p973_p1, %p970_p0 }
   0x8   :  { %978 = shalt.err (!%p975_p2)
}
   0x9   :  { %s979_s27 = scalar_lea.vmem %s31_s19, 4096  ;;  %p984_p4 = scmp.lt.s32.totalorder %s31_s19, %s31_s19 }
   0xa   :  { %p980_p3 = scmp.ne.s32.totalorder %s31_s19, %s979_s27  ;;  %p985_p5 = scmp.lt.s32.totalorder %s979_s27, %s979_s27 }
   0xc   :  { %p986_p6 = por %p985_p5, %p984_p4 }
   0xe   :  { %p987_p7 = pnand %p986_p6, %p980_p3 }
  0x10   :  { %990 = shalt.err (!%p987_p7)
}
  0x11   :  { %s1064_s28 = smov 256   ;;  %s1065_s29 = smov 16  }
  0x12   :  { %36 = dma.hbm_to_vmem [thread:$0]  %s1159_s1, 4096, %s31_s19, [#allocation7], %s1064_s28, %s1064_s28, %s1065_s29  }
  0x13   :  { %s1066_s7 = smov [#allocation3]   ;;  %s991_s11 = scalar_lea.hbm %s1158_s0, 128 }
  0x14   :  { %s18_s8 = sshll.u32 %s1066_s7, 4  ;;  %p992_p8 = scmp.ne.s32.totalorder %s1158_s0, %s991_s11  ;;  %s19_s8 = int_to_ptr.vmem [resolvable:$true] %s18_s8 }
  0x15   :  { %p995_p9 = scmp.lt.u32.totalorder %s991_s11, %s1158_s0 }
  0x17   :  { %p997_p10 = pnand %p995_p9, %p992_p8 }
  0x19   :  { %1000 = shalt.err (!%p997_p10)
}
  0x1a   :  { %s1001_s16 = scalar_lea.vmem %s19_s8, 128  ;;  %p1006_p12 = scmp.lt.s32.totalorder %s19_s8, %s19_s8 }
  0x1b   :  { %p1002_p11 = scmp.ne.s32.totalorder %s19_s8, %s1001_s16  ;;  %p1007_p13 = scmp.lt.s32.totalorder %s1001_s16, %s1001_s16 }
  0x1d   :  { %p1008_p0 = por %p1007_p13, %p1006_p12 }
  0x1f   :  { %p1009_p1 = pnand %p1008_p0, %p1002_p11 }
  0x21   :  { %1012 = shalt.err (!%p1009_p1)
}
  0x22   :  { %s1067_s1 = smov 64   ;;  %s1068_s17 = smov 4  }
  0x23   :  { %24 = dma.hbm_to_vmem [thread:$0]  %s1158_s0, 128, %s19_s8, [#allocation4], %s1067_s1, %s1067_s1, %s1068_s17  }
  0x24   :  { %s1069_s20 = smov [#allocation8]   ;;  %s1013_s24 = scalar_lea.hbm %s1161_s3, 4096 }
  0x25   :  { %s44_s21 = sshll.u32 %s1069_s20, 4  ;;  %p1014_p2 = scmp.ne.s32.totalorder %s1161_s3, %s1013_s24  ;;  %s45_s21 = int_to_ptr.vmem [resolvable:$true] %s44_s21 }
  0x26   :  { %p1017_p3 = scmp.lt.u32.totalorder %s1013_s24, %s1161_s3 }
  0x28   :  { %p1019_p4 = pnand %p1017_p3, %p1014_p2 }
  0x2a   :  { %1022 = shalt.err (!%p1019_p4)
}
  0x2b   :  { %s1023_s29 = scalar_lea.vmem %s45_s21, 4096  ;;  %p1028_p6 = scmp.lt.s32.totalorder %s45_s21, %s45_s21 }
  0x2c   :  { %p1024_p5 = scmp.ne.s32.totalorder %s45_s21, %s1023_s29  ;;  %p1029_p7 = scmp.lt.s32.totalorder %s1023_s29, %s1023_s29 }
  0x2e   :  { %p1030_p8 = por %p1029_p7, %p1028_p6 }
  0x30   :  { %p1031_p9 = pnand %p1030_p8, %p1024_p5 }
  0x32   :  { %1034 = shalt.err (!%p1031_p9)
}
  0x33   :  { %50 = dma.hbm_to_vmem [thread:$0]  %s1161_s3, 4096, %s45_s21, [#allocation7], %s1067_s1, %s1067_s1, %s1068_s17  }
  0x34   :  { %1057 = dma.done.wait [#allocation4], 128  }
  0x35   :  { %1058 = vsyncadd [#allocation4], 4294967168 }
  0x36   :  { %1059 = dma.done.wait [#allocation7], 8192  }
  0x37   :  { %1060 = vsyncadd [#allocation7], 4294959104  ;;  %v1070_v0 = vmov 0   ;;  %v888_v1 = vld [vmem:[#allocation6 + $0x4] ss:$16 sps:$4 sm:$0xff]   ;;  %v936_v34 = vld [vmem:[#allocation3] sm:$0xff]  }
  0x38   :  { %323 = vmatprep.mubr.bf16.mxu0 %v1070_v0  ;;  %366 = vmatprep.mubr.bf16.mxu1 %v1070_v0  ;;  %v890_v2 = vld [vmem:[#allocation6 + $0xc] ss:$16 sps:$4 sm:$0xff]   ;;  %v892_v3 = vld [vmem:[#allocation6] ss:$16 sps:$4 sm:$0xff]   ;;  %v893_v4 = vld [vmem:[#allocation6 + $0x8] ss:$16 sps:$4 sm:$0xff]  }
  0x39   :  { %291 = vmatprep.subr.bf16.mxu0 %v888_v1  ;;  %334 = vmatprep.subr.bf16.mxu1 %v890_v2  ;;  %v894_v5 = vld [vmem:[#allocation6 + $0x24] ss:$16 sps:$4 sm:$0xff]   ;;  %v896_v6 = vld [vmem:[#allocation6 + $0x2c] ss:$16 sps:$4 sm:$0xff]   ;;  %v898_v7 = vld [vmem:[#allocation6 + $0x20] ss:$16 sps:$4 sm:$0xff]   ;;  %v105_v2 = vlaneseq }
  0x3a   :  { %292 = vmatpush1.bf16.msra.mxu0 %v892_v3  ;;  %335 = vmatpush1.bf16.msra.mxu1 %v893_v4  ;;  %v899_v8 = vld [vmem:[#allocation6 + $0x28] ss:$16 sps:$4 sm:$0xff]   ;;  %v900_v9 = vld [vmem:[#allocation6 + $0x44] ss:$16 sps:$4 sm:$0xff]   ;;  %v902_v10 = vld [vmem:[#allocation6 + $0x4c] ss:$16 sps:$4 sm:$0xff]  }
  0x3b   :  { %293 = vmatprep.subr.bf16.mxu0 %v894_v5  ;;  %336 = vmatprep.subr.bf16.mxu1 %v896_v6  ;;  %v904_v11 = vld [vmem:[#allocation6 + $0x40] ss:$16 sps:$4 sm:$0xff]   ;;  %v905_v12 = vld [vmem:[#allocation6 + $0x48] ss:$16 sps:$4 sm:$0xff]   ;;  %v906_v13 = vld [vmem:[#allocation6 + $0x64] ss:$16 sps:$4 sm:$0xff]  }
  0x3c   :  { %v908_v14 = vld [vmem:[#allocation6 + $0x6c] ss:$16 sps:$4 sm:$0xff]   ;;  %v910_v15 = vld [vmem:[#allocation6 + $0x60] ss:$16 sps:$4 sm:$0xff]   ;;  %v911_v16 = vld [vmem:[#allocation6 + $0x68] ss:$16 sps:$4 sm:$0xff]  }
  0x3d   :  { %v912_v17 = vld [vmem:[#allocation6 + $0x84] ss:$16 sps:$4 sm:$0xff]   ;;  %v914_v18 = vld [vmem:[#allocation6 + $0x8c] ss:$16 sps:$4 sm:$0xff]   ;;  %v916_v19 = vld [vmem:[#allocation6 + $0x80] ss:$16 sps:$4 sm:$0xff]  }
  0x3e   :  { %294 = vmatpush1.bf16.msra.mxu0 %v898_v7  ;;  %337 = vmatpush1.bf16.msra.mxu1 %v899_v8  ;;  %v917_v20 = vld [vmem:[#allocation6 + $0x88] ss:$16 sps:$4 sm:$0xff]   ;;  %v918_v21 = vld [vmem:[#allocation6 + $0xa4] ss:$16 sps:$4 sm:$0xff]   ;;  %v920_v22 = vld [vmem:[#allocation6 + $0xac] ss:$16 sps:$4 sm:$0xff]  }
  0x3f   :  { %295 = vmatprep.subr.bf16.mxu0 %v900_v9  ;;  %338 = vmatprep.subr.bf16.mxu1 %v902_v10  ;;  %v922_v23 = vld [vmem:[#allocation6 + $0xa0] ss:$16 sps:$4 sm:$0xff]   ;;  %v923_v24 = vld [vmem:[#allocation6 + $0xa8] ss:$16 sps:$4 sm:$0xff]   ;;  %v924_v25 = vld [vmem:[#allocation6 + $0xc4] ss:$16 sps:$4 sm:$0xff]  }
  0x40   :  { %v926_v26 = vld [vmem:[#allocation6 + $0xcc] ss:$16 sps:$4 sm:$0xff]   ;;  %v928_v27 = vld [vmem:[#allocation6 + $0xc0] ss:$16 sps:$4 sm:$0xff]   ;;  %v929_v28 = vld [vmem:[#allocation6 + $0xc8] ss:$16 sps:$4 sm:$0xff]  }
  0x41   :  { %v930_v29 = vld [vmem:[#allocation6 + $0xe4] ss:$16 sps:$4 sm:$0xff]   ;;  %v932_v30 = vld [vmem:[#allocation6 + $0xec] ss:$16 sps:$4 sm:$0xff]   ;;  %v934_v31 = vld [vmem:[#allocation6 + $0xe0] ss:$16 sps:$4 sm:$0xff]  }
  0x42   :  { %296 = vmatpush1.bf16.msra.mxu0 %v904_v11  ;;  %339 = vmatpush1.bf16.msra.mxu1 %v905_v12  ;;  %v935_v32 = vld [vmem:[#allocation6 + $0xe8] ss:$16 sps:$4 sm:$0xff]   ;;  %v937_v33 = vld [vmem:[#allocation8 + $0x40] sm:$0xff]   ;;  %v945_v42 = vld [vmem:[#allocation8 + $0x50] sm:$0xff]   ;;  %v106_v3 = vshrl.u32 %v105_v2, 7  ;;  %s1071_s8 = smov [#allocation9]  }
  0x43   :  { %297 = vmatprep.subr.bf16.mxu0 %v906_v13  ;;  %340 = vmatprep.subr.bf16.mxu1 %v908_v14  ;;  %v938_v35 = vld [vmem:[#allocation8 + $0xc0] sm:$0xff]   ;;  %v941_v38 = vld [vmem:[#allocation8 + $0x48] sm:$0xff]   ;;  %v946_v43 = vld [vmem:[#allocation8 + $0xd0] sm:$0xff]   ;;  %s754_s9 = sshll.u32 %s1071_s8, 4  ;;  %s755_s9 = int_to_ptr.vmem [resolvable:$true] %s754_s9 }
  0x44   :  { %v939_v36 = vld [vmem:[#allocation8] sm:$0xff]   ;;  %v942_v39 = vld [vmem:[#allocation8 + $0xc8] sm:$0xff]   ;;  %v947_v44 = vld [vmem:[#allocation8 + $0x10] sm:$0xff]   ;;  %v107_v4 = vsub.s32 0, %v106_v3  ;;  %v115_v5 = vsub.s32 2, %v106_v3  ;;  %v111_v7 = vsub.s32 1, %v106_v3  ;;  %p1040_p11 = scmp.lt.s32.totalorder %s755_s9, %s755_s9 }
  0x45   :  { %v940_v37 = vld [vmem:[#allocation8 + $0x80] sm:$0xff]   ;;  %v943_v40 = vld [vmem:[#allocation8 + $0x8] sm:$0xff]   ;;  %v948_v45 = vld [vmem:[#allocation8 + $0x90] sm:$0xff]   ;;  %v119_v8 = vsub.s32 3, %v106_v3  ;;  %s1035_s10 = scalar_lea.vmem %s755_s9, 256 }
  0x46   :  { %298 = vmatpush1.bf16.msra.mxu0 %v910_v15  ;;  %341 = vmatpush1.bf16.msra.mxu1 %v911_v16  ;;  %v944_v41 = vld [vmem:[#allocation8 + $0x88] sm:$0xff]   ;;  %v949_v46 = vld [vmem:[#allocation8 + $0x58] sm:$0xff]   ;;  %v953_v50 = vld [vmem:[#allocation8 + $0x60] sm:$0xff]   ;;  %p1036_p10 = scmp.ne.s32.totalorder %s755_s9, %s1035_s10  ;;  %p1041_p12 = scmp.lt.s32.totalorder %s1035_s10, %s1035_s10 }
  0x47   :  { %299 = vmatprep.subr.bf16.mxu0 %v912_v17  ;;  %342 = vmatprep.subr.bf16.mxu1 %v914_v18  ;;  %v950_v47 = vld [vmem:[#allocation8 + $0xd8] sm:$0xff]   ;;  %v954_v51 = vld [vmem:[#allocation8 + $0xe0] sm:$0xff]   ;;  %v957_v54 = vld [vmem:[#allocation8 + $0x68] sm:$0xff]  }
  0x48   :  { %v951_v48 = vld [vmem:[#allocation8 + $0x18] sm:$0xff]   ;;  %v955_v52 = vld [vmem:[#allocation8 + $0x20] sm:$0xff]   ;;  %v958_v55 = vld [vmem:[#allocation8 + $0xe8] sm:$0xff]   ;;  %p1042_p13 = por %p1041_p12, %p1040_p11 }
  0x49   :  { %v952_v49 = vld [vmem:[#allocation8 + $0x98] sm:$0xff]   ;;  %v956_v53 = vld [vmem:[#allocation8 + $0xa0] sm:$0xff]   ;;  %v959_v56 = vld [vmem:[#allocation8 + $0x28] sm:$0xff]  }
  0x4a   :  { %300 = vmatpush1.bf16.msra.mxu0 %v916_v19  ;;  %343 = vmatpush1.bf16.msra.mxu1 %v917_v20  ;;  %v960_v57 = vld [vmem:[#allocation8 + $0xa8] sm:$0xff]   ;;  %v961_v58 = vld [vmem:[#allocation8 + $0x70] sm:$0xff]   ;;  %v965_v62 = vld [vmem:[#allocation8 + $0x78] sm:$0xff]   ;;  %p1043_p0 = pnand %p1042_p13, %p1036_p10 }
  0x4b   :  { %301 = vmatprep.subr.bf16.mxu0 %v918_v21  ;;  %344 = vmatprep.subr.bf16.mxu1 %v920_v22  ;;  %v962_v59 = vld [vmem:[#allocation8 + $0xf0] sm:$0xff]   ;;  %v966_v63 = vld [vmem:[#allocation8 + $0xf8] sm:$0xff]  }
  0x4c   :  { %v963_v60 = vld [vmem:[#allocation8 + $0x30] sm:$0xff]   ;;  %v967_v0 = vld [vmem:[#allocation8 + $0x38] sm:$0xff]  }
  0x4d   :  { %v964_v61 = vld [vmem:[#allocation8 + $0xb0] sm:$0xff]   ;;  %v968_v1 = vld [vmem:[#allocation8 + $0xb8] sm:$0xff]  }
  0x4e   :  { %302 = vmatpush1.bf16.msra.mxu0 %v922_v23  ;;  %345 = vmatpush1.bf16.msra.mxu1 %v923_v24  ;;  %v103_v6 = vld [vmem:[%s1160_s2] sm:$0xf] }
  0x4f   :  { %303 = vmatprep.subr.bf16.mxu0 %v924_v25  ;;  %346 = vmatprep.subr.bf16.mxu1 %v926_v26  ;;  %v108_v9 = vrot.slane %v103_v6, %v107_v4  ;;  %v116_v10 = vrot.slane %v103_v6, %v115_v5  ;;  %v112_v11 = vrot.slane %v103_v6, %v111_v7 }
  0x50   :  { %v120_v12 = vrot.slane %v103_v6, %v119_v8 }
  0x52   :  { %304 = vmatpush1.bf16.msra.mxu0 %v928_v27  ;;  %347 = vmatpush1.bf16.msra.mxu1 %v929_v28 }
  0x53   :  { %305 = vmatprep.subr.bf16.mxu0 %v930_v29  ;;  %348 = vmatprep.subr.bf16.mxu1 %v932_v30 }
  0x56   :  { %306 = vmatpush1.bf16.msra.mxu0 %v934_v31  ;;  %349 = vmatpush1.bf16.msra.mxu1 %v935_v32 }
  0x57   :  { %833 = vmatprep.subr.bf16.mxu0 %v937_v33  ;;  %855 = vmatprep.subr.bf16.mxu1 %v938_v35 }
  0x59   :  { %324 = vmatmul.mubr.bf16.vlgmr.msra.gmra.mrb[0].mxu0 %v936_v34  ;;  %367 = vmatmul.mubr.bf16.vlgmr.msra.gmra.mrb[0].mxu1 %v936_v34 }
  0x5a   :  { %834 = vmatpush3.bf16.msra.mxu0 %v939_v36  ;;  %856 = vmatpush3.bf16.msra.mxu1 %v940_v37 }
  0x5b   :  { %835 = vmatprep.subr.bf16.mxu0 %v941_v38  ;;  %857 = vmatprep.subr.bf16.mxu1 %v942_v39 }
  0x5e   :  { %836 = vmatpush3.bf16.msra.mxu0 %v943_v40  ;;  %858 = vmatpush3.bf16.msra.mxu1 %v944_v41 }
  0x5f   :  { %837 = vmatprep.subr.bf16.mxu0 %v945_v42  ;;  %859 = vmatprep.subr.bf16.mxu1 %v946_v43 }
  0x62   :  { %838 = vmatpush3.bf16.msra.mxu0 %v947_v44  ;;  %860 = vmatpush3.bf16.msra.mxu1 %v948_v45 }
  0x63   :  { %839 = vmatprep.subr.bf16.mxu0 %v949_v46  ;;  %861 = vmatprep.subr.bf16.mxu1 %v950_v47 }
  0x66   :  { %840 = vmatpush3.bf16.msra.mxu0 %v951_v48  ;;  %862 = vmatpush3.bf16.msra.mxu1 %v952_v49  ;;  %v832_v49 = vld [vmem:[%s1162_s4] ss:$0 sm:$0xff] }
  0x67   :  { %841 = vmatprep.subr.bf16.mxu0 %v953_v50  ;;  %863 = vmatprep.subr.bf16.mxu1 %v954_v51 }
  0x6a   :  { %842 = vmatpush3.bf16.msra.mxu0 %v955_v52  ;;  %864 = vmatpush3.bf16.msra.mxu1 %v956_v53 }
  0x6b   :  { %843 = vmatprep.subr.bf16.mxu0 %v957_v54  ;;  %865 = vmatprep.subr.bf16.mxu1 %v958_v55 }
  0x6e   :  { %844 = vmatpush3.bf16.msra.mxu0 %v959_v56  ;;  %866 = vmatpush3.bf16.msra.mxu1 %v960_v57 }
  0x6f   :  { %845 = vmatprep.subr.bf16.mxu0 %v961_v58  ;;  %867 = vmatprep.subr.bf16.mxu1 %v962_v59 }
  0x72   :  { %846 = vmatpush3.bf16.msra.mxu0 %v963_v60  ;;  %868 = vmatpush3.bf16.msra.mxu1 %v964_v61 }
  0x73   :  { %847 = vmatprep.subr.bf16.mxu0 %v965_v62  ;;  %869 = vmatprep.subr.bf16.mxu1 %v966_v63 }
  0x76   :  { %848 = vmatpush3.bf16.msra.mxu0 %v967_v0  ;;  %870 = vmatpush3.bf16.msra.mxu1 %v968_v1 }
 0x12c   :  { %v325_v13 = vpop.f32.mrb[0].mxu0  ;;  %v368_v14 = vpop.f32.mrb[0].mxu1 }
 0x12d   :  { %v326_v15 = vadd.f32 %v325_v13, %v108_v9  ;;  %v369_v16 = vadd.f32 %v368_v14, %v116_v10  ;;  %v327_v17 = vpop.f32.mrb[1].mxu0  ;;  %v370_v18 = vpop.f32.mrb[1].mxu1 }
 0x12e   :  { %v328_v19 = vadd.f32 %v327_v17, %v112_v11  ;;  %v371_v20 = vadd.f32 %v370_v18, %v120_v12  ;;  %v329_v21 = vpop.f32.mrb[2].mxu0  ;;  %v372_v22 = vpop.f32.mrb[2].mxu1 }
 0x12f   :  { %v330_v23 = vadd.f32 %v329_v21, %v108_v9  ;;  %v373_v24 = vadd.f32 %v372_v22, %v116_v10  ;;  %v331_v25 = vpop.f32.mrb[3].mxu0  ;;  %v374_v26 = vpop.f32.mrb[3].mxu1  ;;  %v377_v29 = vmax.f32 %v326_v15, 0.0  ;;  %v379_v30 = vmax.f32 %v369_v16, 0.0 }
 0x130   :  { %v332_v27 = vadd.f32 %v331_v25, %v112_v11  ;;  %v375_v28 = vadd.f32 %v374_v26, %v120_v12  ;;  %v378_v33 = vmax.f32 %v328_v19, 0.0  ;;  %v380_v34 = vmax.f32 %v371_v20, 0.0 }
 0x131   :  { %v381_v31 = vmax.f32 %v330_v23, 0.0  ;;  %v383_v32 = vmax.f32 %v373_v24, 0.0 }
 0x132   :  { %v382_v35 = vmax.f32 %v332_v27, 0.0  ;;  %v384_v36 = vmax.f32 %v375_v28, 0.0 }
 0x133   :  { %v387_v37 = vpack.c.bf16 %v381_v31, %v377_v29  ;;  %v389_v38 = vpack.c.bf16 %v383_v32, %v379_v30 }
 0x134   :  { %v388_v39 = vpack.c.bf16 %v382_v35, %v378_v33  ;;  %v390_v40 = vpack.c.bf16 %v384_v36, %v380_v34 }
 0x136   :  { %679 = vmatprep.mubr.bf16.mxu0 %v388_v39  ;;  %720 = vmatprep.mubr.bf16.mxu1 %v390_v40 }
 0x137   :  { %680 = vmatmul.mubr.bf16.vlgmr.msra.gmra.mrb[4].mxu0 %v387_v37  ;;  %721 = vmatmul.mubr.bf16.vlgmr.msra.gmra.mrb[4].mxu1 %v389_v38 }
 0x20a   :  { %v849_v41 = vpop.f32.mrb[4].mxu0  ;;  %v871_v42 = vpop.f32.mrb[4].mxu1 }
 0x20b   :  { %v850_v43 = vpop.f32.mrb[5].mxu0  ;;  %v872_v44 = vpop.f32.mrb[5].mxu1 }
 0x20c   :  { %v851_v45 = vadd.f32 %v850_v43, %v849_v41  ;;  %v873_v46 = vadd.f32 %v872_v44, %v871_v42  ;;  %v852_v47 = vpop.f32.mrb[6].mxu0  ;;  %v874_v48 = vpop.f32.mrb[6].mxu1 }
 0x20d   :  { %v853_v50 = vpop.f32.mrb[7].mxu0  ;;  %v875_v51 = vpop.f32.mrb[7].mxu1 }
 0x20e   :  { %v723_v52 = vadd.f32 %v873_v46, %v851_v45  ;;  %v854_v53 = vadd.f32 %v853_v50, %v852_v47  ;;  %v876_v54 = vadd.f32 %v875_v51, %v874_v48 }
 0x210   :  { %v745_v55 = vadd.f32 %v832_v49, %v723_v52  ;;  %v726_v56 = vadd.f32 %v876_v54, %v854_v53 }
 0x212   :  { %747 = vst [vmem:[#allocation9] sm:$0xff] %v745_v55  ;;  %v746_v57 = vadd.f32 %v832_v49, %v726_v56 }
 0x214   :  { %748 = vst [vmem:[#allocation9 + $0x8] sm:$0xff] %v746_v57 }
 0x215   :  { %1046 = shalt.err (!%p1043_p0)
}
 0x216   :  { %s1047_s12 = scalar_lea.hbm %s1163_s5, 256 }
 0x217   :  { %p1048_p1 = scmp.ne.s32.totalorder %s1163_s5, %s1047_s12  ;;  %p1051_p2 = scmp.lt.u32.totalorder %s1047_s12, %s1163_s5 }
 0x219   :  { %p1053_p3 = pnand %p1051_p2, %p1048_p1 }
 0x21b   :  { %1056 = shalt.err (!%p1053_p3)
}
 0x21c   :  { %s1072_s1 = smov 128   ;;  %s1073_s17 = smov 8  }
 0x21d   :  { %760 = dma.vmem_to_hbm [thread:$0]  %s755_s9, 256, %s1163_s5, [#allocation5], %s1072_s1, %s1072_s1, %s1073_s17  }
 0x21e   :  { %1061 = dma.done.wait [#allocation5], 256  }
 0x21f   :  { %1062 = vsyncadd [#allocation5], 4294967040 }
 0x220   :  { %764 = vsyncpa [#allocation4], 1 }
 0x221   :  { %765 = vsyncpa [#allocation7], 1 }
 0x222   :  { %766 = vsyncpa [#allocation5], 1 }

</bundles_post_ra>
